<compile_context>
chip_gen: v7x
topology: tpu7x:2x2x1
jax: 0.10.0
libtpu: 0.0.40
codegen_flags: <defaults>
</compile_context>

<pallas_src>
import jax
import jax.numpy as jnp
from jax.experimental import pallas as pl
from jax.experimental.pallas import tpu as pltpu


LOGITS_PAD = 128  # lane-dense width for the padded classifier output slab


def moe_head_kernel(a_ref, b_ref,
                    wga_ref, wgb_ref, bg_ref,
                    wca_ref, wcb_ref, bc_ref,
                    logits_ref, comb_ref):
    # a_ref: (TB, H1)   b_ref: (TB, H2)
    a = a_ref[...]
    b = b_ref[...]
    h1 = a_ref.shape[1]
    h2 = b_ref.shape[1]

    # gate projection without concatenation:
    #   proj = cat(a, b) @ Wg + bg  ==  a @ Wg[:H1] + b @ Wg[H1:] + bg
    proj = (jnp.dot(a, wga_ref[...], preferred_element_type=jnp.float32)
            + jnp.dot(b, wgb_ref[...], preferred_element_type=jnp.float32)
            + bg_ref[...])                                        # (TB, D//2)

    # softmax over the projected features (dim=1); only cols 0 & 1 are used.
    m = jnp.max(proj, axis=1, keepdims=True)
    e = jnp.exp(proj - m)
    inv = pl.reciprocal(jnp.sum(e, axis=1, keepdims=True), approx=True)
    w = e * inv

    w_a = w[:, 0:1]
    w_b = w[:, 1:2]

    wa = a * w_a                                                  # (TB, H1)
    wb = b * w_b                                                  # (TB, H2)

    # combined = cat(a*wA, b*wB) written as two direct slice stores
    comb_ref[:, pl.ds(0, h1)] = wa.astype(comb_ref.dtype)
    comb_ref[:, pl.ds(h1, h2)] = wb.astype(comb_ref.dtype)

    # classifier (padded to 128 lane-dense output columns in the wrapper):
    #   logits = cat(wa, wb) @ Wc + bc == wa @ Wc[:H1] + wb @ Wc[H1:] + bc
    logits_ref[...] = (
        jnp.dot(wa, wca_ref[...], preferred_element_type=jnp.float32)
        + jnp.dot(wb, wcb_ref[...], preferred_element_type=jnp.float32)
        + bc_ref[...])


def moe_forward(emb_a, emb_b, wg, bg, wc, bc, *,
                block_b=512, use_bf16_matmul=False):
    """MoE head forward.  Returns (logits (B, 2), combined (B, H1+H2))."""
    B, H1 = emb_a.shape
    _, H2 = emb_b.shape
    D = H1 + H2
    G = wg.shape[1]            # D // 2
    NC = wc.shape[1]           # 2 classes

    # ---- trace-time weight preparation (all outside the kernel) ----
    # Split weights at the concat boundary (row order matches torch.cat).
    wg_a, wg_b = wg[:H1], wg[H1:]
    wc_a, wc_b = wc[:H1], wc[H1:]
    bg2 = bg.reshape(1, G)

    # Pad the classifier to a lane-dense 128-wide output slab.
    wc_a_p = jnp.pad(wc_a, ((0, 0), (0, LOGITS_PAD - NC)))
    wc_b_p = jnp.pad(wc_b, ((0, 0), (0, LOGITS_PAD - NC)))
    bc_p = jnp.pad(bc.reshape(1, NC), ((0, 0), (0, LOGITS_PAD - NC)))

    if use_bf16_matmul:
        # bf16 operands with f32 accumulation: full MXU rate on v6e/v7x and
        # half the DMA bytes for the gate weights.  (v7x: keep bf16, NOT int8.)
        emb_a = emb_a.astype(jnp.bfloat16)
        emb_b = emb_b.astype(jnp.bfloat16)
        wg_a = wg_a.astype(jnp.bfloat16)
        wg_b = wg_b.astype(jnp.bfloat16)

    # ---- batch grid (auto-pipelined; megacore "parallel" on v7x) ----
    TB = min(B, block_b)
    grid = (pl.cdiv(B, TB),)

    def batch_spec(cols):
        return pl.BlockSpec((TB, cols), lambda i: (i, 0))

    def resident_spec(shape):
        # constant index_map -> weights/biases stay resident in VMEM
        return pl.BlockSpec(shape, lambda i: (0, 0))

    itm = 4  # f32 bytes
    cost = pl.CostEstimate(
        flops=2 * B * D * G + 2 * B * D * LOGITS_PAD + 6 * B * G,
        transcendentals=B * G,
        bytes_accessed=(B * D                       # embeddings in
                        + D * G + G                 # gate weights/bias
                        + D * LOGITS_PAD + LOGITS_PAD   # classifier (padded)
                        + B * LOGITS_PAD + B * D    # outputs
                        ) * itm,
    )

    logits_pad, combined = pl.pallas_call(
        moe_head_kernel,
        out_shape=(
            jax.ShapeDtypeStruct((B, LOGITS_PAD), jnp.float32),
            jax.ShapeDtypeStruct((B, D), jnp.float32),
        ),
        grid=grid,
        in_specs=[
            batch_spec(H1),                     # emb_a
            batch_spec(H2),                     # emb_b
            resident_spec((H1, G)),             # wg_a
            resident_spec((H2, G)),             # wg_b
            resident_spec((1, G)),              # bg
            resident_spec((H1, LOGITS_PAD)),    # wc_a (padded)
            resident_spec((H2, LOGITS_PAD)),    # wc_b (padded)
            resident_spec((1, LOGITS_PAD)),     # bc (padded)
        ],
        out_specs=(
            pl.BlockSpec((TB, LOGITS_PAD), lambda i: (i, 0)),
            pl.BlockSpec((TB, D), lambda i: (i, 0)),
        ),
        compiler_params=pltpu.CompilerParams(
            dimension_semantics=("parallel",),
            vmem_limit_bytes=64 * 1024 * 1024,
        ),
        cost_estimate=cost,
    )(emb_a, emb_b, wg_a, wg_b, bg2, wc_a_p, wc_b_p, bc_p)

    # Slicing off the zero-padded logit columns is free layout plumbing.
    return logits_pad[:, :NC], combined


def moe_forward_ref(emb_a, emb_b, wg, bg, wc, bc):
    """Pure-JAX reference mirroring the PyTorch forward."""
    cat = jnp.concatenate([emb_a, emb_b], axis=1)
    proj = cat @ wg + bg
    w = jax.nn.softmax(proj, axis=1)
    combined = jnp.concatenate([emb_a * w[:, 0:1], emb_b * w[:, 1:2]], axis=1)
    logits = combined @ wc + bc
    return logits, combined


if __name__ == "__main__":
    # Small shapes consistent with the module: two pooled embeddings.
    B = 8          # batch
    H1 = 32        # hidden_size1
    H2 = 32        # hidden_size2
    D = H1 + H2    # combined_input_dim

    key = jax.random.PRNGKey(0)
    k_a, k_b, k_wg, k_bg, k_wc, k_bc = jax.random.split(key, 6)

    emb_a = jax.random.normal(k_a, (B, H1), dtype=jnp.float32)
    emb_b = jax.random.normal(k_b, (B, H2), dtype=jnp.float32)

    # Gate: D -> D//2, classifier: D -> 2, stored as (in, out).
    wg = jax.random.normal(k_wg, (D, D // 2), dtype=jnp.float32) * 0.05
    bg = jax.random.normal(k_bg, (1, D // 2), dtype=jnp.float32) * 0.05
    wc = jax.random.normal(k_wc, (D, 2), dtype=jnp.float32) * 0.05
    bc = jax.random.normal(k_bc, (1, 2), dtype=jnp.float32) * 0.05

    logits, combined = moe_forward(emb_a, emb_b, wg, bg, wc, bc)
    jax.block_until_ready((logits, combined))

    ref_logits, ref_combined = moe_forward_ref(emb_a, emb_b, wg, bg, wc, bc)
    # Tolerance relaxed vs f32-exact because the softmax denominator uses the
    # EUP approx reciprocal (~1e-3 relative error).
    assert jnp.allclose(logits, ref_logits, atol=1e-2, rtol=1e-2), "logits mismatch"
    assert jnp.allclose(combined, ref_combined, atol=1e-2, rtol=1e-2), "combined mismatch"

    print("KERNEL_OK")
</pallas_src>

<mosaic_0001>
module attributes {stable_mosaic.version = 11 : i64} {
  func.func @moe_head_kernel(%arg0: i32, %arg1: memref<8x32xf32, #tpu.memory_space<vmem>>, %arg2: memref<8x32xf32, #tpu.memory_space<vmem>>, %arg3: memref<32x32xf32, #tpu.memory_space<vmem>>, %arg4: memref<32x32xf32, #tpu.memory_space<vmem>>, %arg5: memref<1x32xf32, #tpu.memory_space<vmem>>, %arg6: memref<32x128xf32, #tpu.memory_space<vmem>>, %arg7: memref<32x128xf32, #tpu.memory_space<vmem>>, %arg8: memref<1x128xf32, #tpu.memory_space<vmem>>, %arg9: memref<8x128xf32, #tpu.memory_space<vmem>>, %arg10: memref<8x64xf32, #tpu.memory_space<vmem>>) attributes {dimension_semantics = [#tpu.dimension_semantics<parallel>], iteration_bounds = array<i64: 1>, scalar_prefetch = 0 : i64, scratch_operands = 0 : i64, tpu.core_type = #tpu.core_type<tc>, window_params = [{transform_indices = @transform_0, window_bounds = array<i64: 8, 32>}, {transform_indices = @transform_1, window_bounds = array<i64: 8, 32>}, {pipeline_mode = #tpu.pipeline_mode<synchronous>, transform_indices = @transform_2, window_bounds = array<i64: 32, 32>}, {pipeline_mode = #tpu.pipeline_mode<synchronous>, transform_indices = @transform_3, window_bounds = array<i64: 32, 32>}, {pipeline_mode = #tpu.pipeline_mode<synchronous>, transform_indices = @transform_4, window_bounds = array<i64: 1, 32>}, {pipeline_mode = #tpu.pipeline_mode<synchronous>, transform_indices = @transform_5, window_bounds = array<i64: 32, 128>}, {pipeline_mode = #tpu.pipeline_mode<synchronous>, transform_indices = @transform_6, window_bounds = array<i64: 32, 128>}, {pipeline_mode = #tpu.pipeline_mode<synchronous>, transform_indices = @transform_7, window_bounds = array<i64: 1, 128>}, {transform_indices = @transform_8, window_bounds = array<i64: 8, 128>}, {transform_indices = @transform_9, window_bounds = array<i64: 8, 64>}]} {
    %c0 = arith.constant 0 : index
    %c0_0 = arith.constant 0 : index
    %0 = vector.load %arg1[%c0, %c0_0] : memref<8x32xf32, #tpu.memory_space<vmem>>, vector<8x32xf32>
    %c0_1 = arith.constant 0 : index
    %c0_2 = arith.constant 0 : index
    %1 = vector.load %arg2[%c0_1, %c0_2] : memref<8x32xf32, #tpu.memory_space<vmem>>, vector<8x32xf32>
    %c0_3 = arith.constant 0 : index
    %c0_4 = arith.constant 0 : index
    %2 = vector.load %arg3[%c0_3, %c0_4] : memref<32x32xf32, #tpu.memory_space<vmem>>, vector<32x32xf32>
    %cst = arith.constant dense<0.000000e+00> : vector<8x32xf32>
    %3 = tpu.matmul %0, %2, %cst {dimension_numbers = #tpu.dot_dimension_numbers<[1], [0], [0], [1], [0, 0, 1, 1], [], []>} : vector<8x32xf32>, vector<32x32xf32>, vector<8x32xf32> -> vector<8x32xf32>
    %c0_5 = arith.constant 0 : index
    %c0_6 = arith.constant 0 : index
    %4 = vector.load %arg4[%c0_5, %c0_6] : memref<32x32xf32, #tpu.memory_space<vmem>>, vector<32x32xf32>
    %cst_7 = arith.constant dense<0.000000e+00> : vector<8x32xf32>
    %5 = tpu.matmul %1, %4, %cst_7 {dimension_numbers = #tpu.dot_dimension_numbers<[1], [0], [0], [1], [0, 0, 1, 1], [], []>} : vector<8x32xf32>, vector<32x32xf32>, vector<8x32xf32> -> vector<8x32xf32>
    %6 = arith.addf %3, %5 : vector<8x32xf32>
    %c0_8 = arith.constant 0 : index
    %c0_9 = arith.constant 0 : index
    %7 = vector.load %arg5[%c0_8, %c0_9] : memref<1x32xf32, #tpu.memory_space<vmem>>, vector<1x32xf32>
    %8 = vector.broadcast %7 : vector<1x32xf32> to vector<8x32xf32>
    %9 = arith.addf %6, %8 : vector<8x32xf32>
    %cst_10 = arith.constant dense<0xFF800000> : vector<8xf32>
    %10 = vector.multi_reduction <maximumf>, %9, %cst_10 [1] : vector<8x32xf32> to vector<8xf32>
    %11 = vector.shape_cast %10 : vector<8xf32> to vector<8x1xf32>
    %12 = vector.broadcast %11 : vector<8x1xf32> to vector<8x32xf32>
    %13 = arith.subf %9, %12 : vector<8x32xf32>
    %14 = math.exp %13 : vector<8x32xf32>
    %cst_11 = arith.constant dense<0.000000e+00> : vector<8xf32>
    %15 = vector.multi_reduction <add>, %14, %cst_11 [1] : vector<8x32xf32> to vector<8xf32>
    %16 = vector.shape_cast %15 : vector<8xf32> to vector<8x1xf32>
    %17 = tpu.reciprocal %16 {approx = true} : vector<8x1xf32> -> vector<8x1xf32>
    %18 = vector.broadcast %17 : vector<8x1xf32> to vector<8x32xf32>
    %19 = arith.mulf %14, %18 : vector<8x32xf32>
    %20 = vector.extract_strided_slice %19 {offsets = [0, 0], sizes = [8, 1], strides = [1, 1]} : vector<8x32xf32> to vector<8x1xf32>
    %21 = vector.extract_strided_slice %19 {offsets = [0, 1], sizes = [8, 1], strides = [1, 1]} : vector<8x32xf32> to vector<8x1xf32>
    %22 = vector.broadcast %20 : vector<8x1xf32> to vector<8x32xf32>
    %23 = arith.mulf %0, %22 : vector<8x32xf32>
    %24 = vector.broadcast %21 : vector<8x1xf32> to vector<8x32xf32>
    %25 = arith.mulf %1, %24 : vector<8x32xf32>
    %c0_12 = arith.constant 0 : index
    %c0_13 = arith.constant 0 : index
    %26 = vector.load %arg10[%c0_12, %c0_13] : memref<8x64xf32, #tpu.memory_space<vmem>>, vector<8x32xf32>
    tpu.vector_store %arg10[%c0_12, %c0_13], %23 {strides = array<i32>} : memref<8x64xf32, #tpu.memory_space<vmem>>, vector<8x32xf32>,
    %c0_14 = arith.constant 0 : index
    %c32 = arith.constant 32 : index
    %27 = vector.load %arg10[%c0_14, %c32] : memref<8x64xf32, #tpu.memory_space<vmem>>, vector<8x32xf32>
    tpu.vector_store %arg10[%c0_14, %c32], %25 {strides = array<i32>} : memref<8x64xf32, #tpu.memory_space<vmem>>, vector<8x32xf32>,
    %c0_15 = arith.constant 0 : index
    %c0_16 = arith.constant 0 : index
    %28 = vector.load %arg6[%c0_15, %c0_16] : memref<32x128xf32, #tpu.memory_space<vmem>>, vector<32x128xf32>
    %cst_17 = arith.constant dense<0.000000e+00> : vector<8x128xf32>
    %29 = tpu.matmul %23, %28, %cst_17 {dimension_numbers = #tpu.dot_dimension_numbers<[1], [0], [0], [1], [0, 0, 1, 1], [], []>} : vector<8x32xf32>, vector<32x128xf32>, vector<8x128xf32> -> vector<8x128xf32>
    %c0_18 = arith.constant 0 : index
    %c0_19 = arith.constant 0 : index
    %30 = vector.load %arg7[%c0_18, %c0_19] : memref<32x128xf32, #tpu.memory_space<vmem>>, vector<32x128xf32>
    %cst_20 = arith.constant dense<0.000000e+00> : vector<8x128xf32>
    %31 = tpu.matmul %25, %30, %cst_20 {dimension_numbers = #tpu.dot_dimension_numbers<[1], [0], [0], [1], [0, 0, 1, 1], [], []>} : vector<8x32xf32>, vector<32x128xf32>, vector<8x128xf32> -> vector<8x128xf32>
    %32 = arith.addf %29, %31 : vector<8x128xf32>
    %c0_21 = arith.constant 0 : index
    %c0_22 = arith.constant 0 : index
    %33 = vector.load %arg8[%c0_21, %c0_22] : memref<1x128xf32, #tpu.memory_space<vmem>>, vector<1x128xf32>
    %34 = vector.broadcast %33 : vector<1x128xf32> to vector<8x128xf32>
    %35 = arith.addf %32, %34 : vector<8x128xf32>
    %c0_23 = arith.constant 0 : index
    %c0_24 = arith.constant 0 : index
    %36 = vector.load %arg9[%c0_23, %c0_24] : memref<8x128xf32, #tpu.memory_space<vmem>>, vector<8x128xf32>
    tpu.vector_store %arg9[%c0_23, %c0_24], %35 {strides = array<i32>} : memref<8x128xf32, #tpu.memory_space<vmem>>, vector<8x128xf32>,
    return
  }
  func.func @transform_0(%arg0: i32) -> (i32, i32) {
    %c0_i32 = arith.constant 0 : i32
    %c0_i32_0 = arith.constant 0 : i32
    return %arg0, %c0_i32 : i32, i32
  }
  func.func @transform_1(%arg0: i32) -> (i32, i32) {
    %c0_i32 = arith.constant 0 : i32
    %c0_i32_0 = arith.constant 0 : i32
    return %arg0, %c0_i32 : i32, i32
  }
  func.func @transform_2(%arg0: i32) -> (i32, i32) {
    %c0_i32 = arith.constant 0 : i32
    %c0_i32_0 = arith.constant 0 : i32
    %c0_i32_1 = arith.constant 0 : i32
    return %c0_i32, %c0_i32_0 : i32, i32
  }
  func.func @transform_3(%arg0: i32) -> (i32, i32) {
    %c0_i32 = arith.constant 0 : i32
    %c0_i32_0 = arith.constant 0 : i32
    %c0_i32_1 = arith.constant 0 : i32
    return %c0_i32, %c0_i32_0 : i32, i32
  }
  func.func @transform_4(%arg0: i32) -> (i32, i32) {
    %c0_i32 = arith.constant 0 : i32
    %c0_i32_0 = arith.constant 0 : i32
    %c0_i32_1 = arith.constant 0 : i32
    return %c0_i32, %c0_i32_0 : i32, i32
  }
  func.func @transform_5(%arg0: i32) -> (i32, i32) {
    %c0_i32 = arith.constant 0 : i32
    %c0_i32_0 = arith.constant 0 : i32
    %c0_i32_1 = arith.constant 0 : i32
    return %c0_i32, %c0_i32_0 : i32, i32
  }
  func.func @transform_6(%arg0: i32) -> (i32, i32) {
    %c0_i32 = arith.constant 0 : i32
    %c0_i32_0 = arith.constant 0 : i32
    %c0_i32_1 = arith.constant 0 : i32
    return %c0_i32, %c0_i32_0 : i32, i32
  }
  func.func @transform_7(%arg0: i32) -> (i32, i32) {
    %c0_i32 = arith.constant 0 : i32
    %c0_i32_0 = arith.constant 0 : i32
    %c0_i32_1 = arith.constant 0 : i32
    return %c0_i32, %c0_i32_0 : i32, i32
  }
  func.func @transform_8(%arg0: i32) -> (i32, i32) {
    %c0_i32 = arith.constant 0 : i32
    %c0_i32_0 = arith.constant 0 : i32
    return %arg0, %c0_i32 : i32, i32
  }
  func.func @transform_9(%arg0: i32) -> (i32, i32) {
    %c0_i32 = arith.constant 0 : i32
    %c0_i32_0 = arith.constant 0 : i32
    return %arg0, %c0_i32 : i32, i32
  }
}

</mosaic_0001>

<bundles_post_ra>
// kernel: tpu_custom_call.1
= control target key start
LH: loop header
LB: loop body
LE: loop exit
PB: predicated region body
PF: predicated region fallthrough
CT: control target
= control target key end

     0   :  { %15 = vsyncpa [#allocation3], 0  ;;  %s1095_s0 = inlined_call_operand.hbm [shape: f32[8,32], index: 0, kind: input, shape index: {}]   ;;  %s1096_s1 = inlined_call_operand.hbm [shape: f32[8,32], index: 1, kind: input, shape index: {}]   ;;  %s1097_s2 = inlined_call_operand.hbm [shape: f32[32,32], index: 2, kind: input, shape index: {}]   ;;  %s1098_s3 = inlined_call_operand.hbm [shape: f32[32,32], index: 3, kind: input, shape index: {}]   ;;  %s1099_s4 = inlined_call_operand.hbm [shape: f32[1,32], index: 4, kind: input, shape index: {}]   ;;  %s1100_s5 = inlined_call_operand.hbm [shape: f32[32,128], index: 5, kind: input, shape index: {}]   ;;  %s1101_s6 = inlined_call_operand.hbm [shape: f32[32,128], index: 6, kind: input, shape index: {}]   ;;  %s1102_s7 = inlined_call_operand.hbm [shape: f32[1,128], index: 7, kind: input, shape index: {}]   ;;  %s1103_s8 = inlined_call_operand.hbm [shape: f32[8,128], index: 8, kind: output, shape index: {0}]   ;;  %s1104_s9 = inlined_call_operand.hbm [shape: f32[8,64], index: 9, kind: output, shape index: {1}]  }
   0x1   :  { %16 = vsyncpa [#allocation6], 0 }
   0x2   :  { %17 = vsyncpa [#allocation9], 0 }
   0x3   :  { %18 = vsyncpa [#allocation12], 0 }
   0x4   :  { %19 = vsyncpa [#allocation15], 0 }
   0x5   :  { %20 = vsyncpa [#allocation4], 0 }
   0x6   :  { %21 = vsyncpa [#allocation18], 0  ;;  %s876_s30 = smov [#allocation5]   ;;  %s642_s13 = scalar_lea.hbm %s1096_s1, 128 }
   0x7   :  { %s38_s10 = sshll.u32 %s876_s30, 4  ;;  %p643_p0 = scmp.ne.s32.totalorder %s1096_s1, %s642_s13  ;;  %s39_s10 = int_to_ptr.vmem [resolvable:$true] %s38_s10 }
   0x8   :  { %p646_p1 = scmp.lt.u32.totalorder %s642_s13, %s1096_s1 }
   0xa   :  { %p648_p2 = pnand %p646_p1, %p643_p0 }
   0xc   :  { %651 = shalt.err (!%p648_p2)
}
   0xd   :  { %s652_s18 = scalar_lea.vmem %s39_s10, 128  ;;  %p657_p4 = scmp.lt.s32.totalorder %s39_s10, %s39_s10 }
   0xe   :  { %p653_p3 = scmp.ne.s32.totalorder %s39_s10, %s652_s18  ;;  %p658_p5 = scmp.lt.s32.totalorder %s652_s18, %s652_s18 }
  0x10   :  { %p659_p6 = por %p658_p5, %p657_p4 }
  0x12   :  { %p660_p7 = pnand %p659_p6, %p653_p3 }
  0x14   :  { %663 = shalt.err (!%p660_p7)
}
  0x15   :  { %41 = dma.hbm_to_vmem [thread:$0]  %s1096_s1, 128, %s39_s10, [#allocation6]  }
  0x16   :  { %s877_s21 = smov [#allocation8]   ;;  %s878_s23 = smov [#allocation11]  }
  0x17   :  { %s59_s22 = sshll.u32 %s877_s21, 4  ;;  %s81_s24 = sshll.u32 %s878_s23, 4  ;;  %s60_s22 = int_to_ptr.vmem [resolvable:$true] %s59_s22  ;;  %s82_s24 = int_to_ptr.vmem [resolvable:$true] %s81_s24 }
  0x18   :  { %s664_s27 = scalar_lea.hbm %s1098_s3, 512 }
  0x19   :  { %p665_p8 = scmp.ne.s32.totalorder %s1098_s3, %s664_s27  ;;  %p668_p9 = scmp.lt.u32.totalorder %s664_s27, %s1098_s3 }
  0x1b   :  { %p670_p10 = pnand %p668_p9, %p665_p8 }
  0x1d   :  { %673 = shalt.err (!%p670_p10)
}
  0x1e   :  { %s674_s1 = scalar_lea.vmem %s60_s22, 512  ;;  %p679_p12 = scmp.lt.s32.totalorder %s60_s22, %s60_s22 }
  0x1f   :  { %p675_p11 = scmp.ne.s32.totalorder %s60_s22, %s674_s1  ;;  %p680_p13 = scmp.lt.s32.totalorder %s674_s1, %s674_s1 }
  0x21   :  { %p681_p0 = por %p680_p13, %p679_p12 }
  0x23   :  { %p682_p1 = pnand %p681_p0, %p675_p11 }
  0x25   :  { %685 = shalt.err (!%p682_p1)
}
  0x26   :  { %s879_s10 = smov 128   ;;  %s880_s12 = smov 8  }
  0x27   :  { %65 = dma.hbm_to_vmem [thread:$0]  %s1098_s3, 512, %s60_s22, [#allocation9], %s879_s10, %s879_s10, %s880_s12  }
  0x28   :  { %s686_s17 = scalar_lea.hbm %s1100_s5, 512 }
  0x29   :  { %p687_p2 = scmp.ne.s32.totalorder %s1100_s5, %s686_s17  ;;  %p690_p3 = scmp.lt.u32.totalorder %s686_s17, %s1100_s5 }
  0x2b   :  { %p692_p4 = pnand %p690_p3, %p687_p2 }
  0x2d   :  { %695 = shalt.err (!%p692_p4)
}
  0x2e   :  { %s696_s23 = scalar_lea.vmem %s82_s24, 512  ;;  %p701_p6 = scmp.lt.s32.totalorder %s82_s24, %s82_s24 }
  0x2f   :  { %p697_p5 = scmp.ne.s32.totalorder %s82_s24, %s696_s23  ;;  %p702_p7 = scmp.lt.s32.totalorder %s696_s23, %s696_s23 }
  0x31   :  { %p703_p8 = por %p702_p7, %p701_p6 }
  0x33   :  { %p704_p9 = pnand %p703_p8, %p697_p5 }
  0x35   :  { %707 = shalt.err (!%p704_p9)
}
  0x36   :  { %87 = dma.hbm_to_vmem [thread:$0]  %s1100_s5, 512, %s82_s24, [#allocation12], %s879_s10, %s879_s10, %s880_s12  }
  0x37   :  { %s881_s25 = smov [#allocation2]   ;;  %s882_s27 = smov [#allocation7]  }
  0x38   :  { %s28_s26 = sshll.u32 %s881_s25, 4  ;;  %s47_s28 = sshll.u32 %s882_s27, 4  ;;  %s29_s26 = int_to_ptr.vmem [resolvable:$true] %s28_s26  ;;  %s48_s28 = int_to_ptr.vmem [resolvable:$true] %s47_s28 }
  0x39   :  { %s708_s11 = scalar_lea.hbm %s1095_s0, 128 }
  0x3a   :  { %p709_p10 = scmp.ne.s32.totalorder %s1095_s0, %s708_s11  ;;  %p712_p11 = scmp.lt.u32.totalorder %s708_s11, %s1095_s0 }
  0x3c   :  { %p714_p12 = pnand %p712_p11, %p709_p10 }
  0x3e   :  { %717 = shalt.err (!%p714_p12)
}
  0x3f   :  { %s718_s5 = scalar_lea.vmem %s29_s26, 128  ;;  %p723_p0 = scmp.lt.s32.totalorder %s29_s26, %s29_s26 }
  0x40   :  { %p719_p13 = scmp.ne.s32.totalorder %s29_s26, %s718_s5  ;;  %p724_p1 = scmp.lt.s32.totalorder %s718_s5, %s718_s5 }
  0x42   :  { %p725_p2 = por %p724_p1, %p723_p0 }
  0x44   :  { %p726_p3 = pnand %p725_p2, %p719_p13 }
  0x46   :  { %729 = shalt.err (!%p726_p3)
}
  0x47   :  { %31 = dma.hbm_to_vmem [thread:$0]  %s1095_s0, 128, %s29_s26, [#allocation3]  }
  0x48   :  { %s730_s19 = scalar_lea.hbm %s1097_s2, 512 }
  0x49   :  { %p731_p4 = scmp.ne.s32.totalorder %s1097_s2, %s730_s19  ;;  %p734_p5 = scmp.lt.u32.totalorder %s730_s19, %s1097_s2 }
  0x4b   :  { %p736_p6 = pnand %p734_p5, %p731_p4 }
  0x4d   :  { %739 = shalt.err (!%p736_p6)
}
  0x4e   :  { %s740_s22 = scalar_lea.vmem %s48_s28, 512  ;;  %p745_p8 = scmp.lt.s32.totalorder %s48_s28, %s48_s28 }
  0x4f   :  { %p741_p7 = scmp.ne.s32.totalorder %s48_s28, %s740_s22  ;;  %p746_p9 = scmp.lt.s32.totalorder %s740_s22, %s740_s22 }
  0x51   :  { %p747_p10 = por %p746_p9, %p745_p8 }
  0x53   :  { %p748_p11 = pnand %p747_p10, %p741_p7 }
  0x55   :  { %751 = shalt.err (!%p748_p11)
}
  0x56   :  { %53 = dma.hbm_to_vmem [thread:$0]  %s1097_s2, 512, %s48_s28, [#allocation6], %s879_s10, %s879_s10, %s880_s12  }
  0x57   :  { %s883_s26 = smov [#allocation10]   ;;  %s884_s29 = smov [#allocation13]  }
  0x58   :  { %s72_s27 = sshll.u32 %s883_s26, 4  ;;  %s93_s30 = sshll.u32 %s884_s29, 4  ;;  %s73_s27 = int_to_ptr.vmem [resolvable:$true] %s72_s27  ;;  %s94_s30 = int_to_ptr.vmem [resolvable:$true] %s93_s30 }
  0x59   :  { %s752_s13 = scalar_lea.hbm %s1099_s4, 16 }
  0x5a   :  { %p753_p12 = scmp.ne.s32.totalorder %s1099_s4, %s752_s13  ;;  %p756_p13 = scmp.lt.u32.totalorder %s752_s13, %s1099_s4 }
  0x5c   :  { %p758_p0 = pnand %p756_p13, %p753_p12 }
  0x5e   :  { %761 = shalt.err (!%p758_p0)
}
  0x5f   :  { %s762_s2 = scalar_lea.vmem %s73_s27, 16  ;;  %s766_s28 = scalar_lea.vmem %s73_s27, 32 }
  0x60   :  { %p763_p1 = scmp.ne.s32.totalorder %s73_s27, %s762_s2  ;;  %p767_p2 = scmp.lt.s32.totalorder %s73_s27, %s73_s27 }
  0x61   :  { %p768_p3 = scmp.lt.s32.totalorder %s766_s28, %s762_s2 }
  0x63   :  { %p769_p4 = por %p768_p3, %p767_p2 }
  0x65   :  { %p770_p5 = pnand %p769_p4, %p763_p1 }
  0x67   :  { %773 = shalt.err (!%p770_p5)
}
  0x68   :  { %75 = dma.hbm_to_vmem [thread:$0]  %s1099_s4, 16, %s73_s27, [#allocation9]  }
  0x69   :  { %s774_s20 = scalar_lea.hbm %s1101_s6, 512 }
  0x6a   :  { %p775_p6 = scmp.ne.s32.totalorder %s1101_s6, %s774_s20  ;;  %p778_p7 = scmp.lt.u32.totalorder %s774_s20, %s1101_s6 }
  0x6c   :  { %p780_p8 = pnand %p778_p7, %p775_p6 }
  0x6e   :  { %783 = shalt.err (!%p780_p8)
}
  0x6f   :  { %s784_s0 = scalar_lea.vmem %s94_s30, 512  ;;  %p789_p10 = scmp.lt.s32.totalorder %s94_s30, %s94_s30 }
  0x70   :  { %p785_p9 = scmp.ne.s32.totalorder %s94_s30, %s784_s0  ;;  %p790_p11 = scmp.lt.s32.totalorder %s784_s0, %s784_s0 }
  0x72   :  { %p791_p12 = por %p790_p11, %p789_p10 }
  0x74   :  { %p792_p13 = pnand %p791_p12, %p785_p9 }
  0x76   :  { %795 = shalt.err (!%p792_p13)
}
  0x77   :  { %99 = dma.hbm_to_vmem [thread:$0]  %s1101_s6, 512, %s94_s30, [#allocation12], %s879_s10, %s879_s10, %s880_s12  }
  0x78   :  { %s885_s26 = smov [#allocation14]   ;;  %s796_s1 = scalar_lea.hbm %s1102_s7, 16 }
  0x79   :  { %s106_s27 = sshll.u32 %s885_s26, 4  ;;  %p797_p0 = scmp.ne.s32.totalorder %s1102_s7, %s796_s1  ;;  %s107_s27 = int_to_ptr.vmem [resolvable:$true] %s106_s27 }
  0x7a   :  { %p800_p1 = scmp.lt.u32.totalorder %s796_s1, %s1102_s7 }
  0x7c   :  { %p802_p2 = pnand %p800_p1, %p797_p0 }
  0x7e   :  { %805 = shalt.err (!%p802_p2)
}
  0x7f   :  { %s806_s24 = scalar_lea.vmem %s107_s27, 16  ;;  %s810_s6 = scalar_lea.vmem %s107_s27, 32 }
  0x80   :  { %p807_p3 = scmp.ne.s32.totalorder %s107_s27, %s806_s24  ;;  %p811_p4 = scmp.lt.s32.totalorder %s107_s27, %s107_s27 }
  0x81   :  { %p812_p5 = scmp.lt.s32.totalorder %s810_s6, %s806_s24 }
  0x83   :  { %p813_p6 = por %p812_p5, %p811_p4 }
  0x85   :  { %p814_p7 = pnand %p813_p6, %p807_p3 }
  0x87   :  { %817 = shalt.err (!%p814_p7)
}
  0x88   :  { %109 = dma.hbm_to_vmem [thread:$0]  %s1102_s7, 16, %s107_s27, [#allocation15]  }
  0x89   :  { %862 = dma.done.wait [#allocation3], 128  }
  0x8a   :  { %863 = vsyncadd [#allocation3], 4294967168 }
  0x8b   :  { %864 = dma.done.wait [#allocation6], 640  }
  0x8c   :  { %865 = vsyncadd [#allocation6], 4294966656 }
  0x8d   :  { %866 = dma.done.wait [#allocation9], 528  }
  0x8e   :  { %867 = vsyncadd [#allocation9], 4294966768 }
  0x8f   :  { %868 = dma.done.wait [#allocation12], 1024  }
  0x90   :  { %869 = vsyncadd [#allocation12], 4294966272 }
  0x91   :  { %870 = dma.done.wait [#allocation15], 16  }
  0x92   :  { %871 = vsyncadd [#allocation15], 4294967280  ;;  %v886_v0 = vmov 0.0|0.0   ;;  %vm887_vm0 = vmmov 0   ;;  %v888_v1 = vmov 0.0   ;;  %v140_v2 = vld [vmem:[#allocation8] sm:$0xff] }
  0x93   :  { %593 = vmatprep.subr.bf16.mxu0 %v886_v0  ;;  %599 = vmatprep.subr.bf16.mxu1 %v886_v0  ;;  %v141_v3 = vld [vmem:[#allocation8 + $0x8] sm:$0xff]  ;;  %v136_v4 = vld [vmem:[#allocation7] sm:$0xff]  ;;  %v142_v7 = vld [vmem:[#allocation8 + $0x10] sm:$0xff]  ;;  %vm144_vm1 = vcmask 261120   ;;  %v889_v29 = vmov 0   ;;  %v890_v30 = vmov 1  }
  0x94   :  { %557 = vmatprep.mubr.msk.f32.mxu0 %vm887_vm0, %v888_v1  ;;  %568 = vmatprep.mubr.msk.f32.mxu1 %vm887_vm0, %v888_v1  ;;  %v594_v5 = vpack.c.bf16 %v141_v3, %v140_v2  ;;  %v137_v6 = vld [vmem:[#allocation7 + $0x8] sm:$0xff]  ;;  %v143_v8 = vld [vmem:[#allocation8 + $0x18] sm:$0xff]  ;;  %v138_v10 = vld [vmem:[#allocation7 + $0x10] sm:$0xff]  ;;  %s891_s7 = smov 32   ;;  %s892_s30 = smov [#allocation17]   ;;  %vm326_vm2 = vcmask 523520  }
  0x95   :  { %v600_v9 = vpack.c.bf16 %v137_v6, %v136_v4  ;;  %v139_v11 = vld [vmem:[#allocation7 + $0x18] sm:$0xff]  ;;  %v597_v12 = vpack.c.bf16 %v143_v8, %v142_v7  ;;  %v134_v15 = vld [vmem:[#allocation2] sm:$0xff]  ;;  %v525_v19 = vld [vmem:[#allocation10] ss:$0 sm:$0xff]  ;;  %635 = vset.pattern.permute.xlu1 %v889_v29  ;;  %637 = vset.pattern.permute.xlu0 %v890_v30  ;;  %s506_s2 = sshll.u32 %s892_s30, 4  ;;  %s507_s2 = int_to_ptr.vmem [resolvable:$true] %s506_s2 }
  0x96   :  { %595 = vmatpush3.bf16.msra.mxu0 %v594_v5  ;;  %v603_v13 = vpack.c.bf16 %v139_v11, %v138_v10  ;;  %v135_v14 = vld [vmem:[#allocation5] sm:$0xff]  ;;  %v328_v31 = vld [vmem:[#allocation11] sm:$0xff]  ;;  %v329_v32 = vld [vmem:[#allocation11 + $0x8] sm:$0xff]  ;;  %s818_s28 = scalar_lea.vmem %s507_s2, 128  ;;  %p823_p9 = scmp.lt.s32.totalorder %s507_s2, %s507_s2 }
  0x97   :  { %601 = vmatpush3.bf16.msra.mxu1 %v600_v9  ;;  %596 = vmatprep.subr.bf16.mxu0 %v886_v0  ;;  %v330_v33 = vld [vmem:[#allocation11 + $0x10] sm:$0xff]  ;;  %v612_v34 = vpack.c.bf16 %v329_v32, %v328_v31  ;;  %v331_v35 = vld [vmem:[#allocation11 + $0x18] sm:$0xff]  ;;  %v332_v39 = vld [vmem:[#allocation13] sm:$0xff]  ;;  %p819_p8 = scmp.ne.s32.totalorder %s507_s2, %s818_s28  ;;  %p824_p10 = scmp.lt.s32.totalorder %s818_s28, %s818_s28 }
  0x98   :  { %602 = vmatprep.subr.bf16.mxu1 %v886_v0  ;;  %v615_v36 = vpack.c.bf16 %v331_v35, %v330_v33  ;;  %v333_v40 = vld [vmem:[#allocation13 + $0x8] sm:$0xff]  ;;  %v334_v43 = vld [vmem:[#allocation13 + $0x10] sm:$0xff]  ;;  %v335_v44 = vld [vmem:[#allocation13 + $0x18] sm:$0xff] }
  0x99   :  { %v606_v42 = vpack.c.bf16 %v333_v40, %v332_v39  ;;  %v609_v45 = vpack.c.bf16 %v335_v44, %v334_v43  ;;  %p825_p11 = por %p824_p10, %p823_p9 }
  0x9a   :  { %598 = vmatpush3.bf16.msra.mxu0 %v597_v12 }
  0x9b   :  { %604 = vmatpush3.bf16.msra.mxu1 %v603_v13  ;;  %605 = vmatprep.subr.bf16.mxu0 %v886_v0  ;;  %p826_p12 = pnand %p825_p11, %p819_p8 }
  0x9c   :  { %611 = vmatprep.subr.bf16.mxu1 %v886_v0 }
  0x9d   :  { %558 = vmatmul.mubr.msk.f32.vlgmr.msra.gmra.mrb[0].mxu0 %vm144_vm1, %v135_v14 }
  0x9e   :  { %569 = vmatmul.mubr.msk.f32.vlgmr.msra.gmra.mrb[0].mxu1 %vm144_vm1, %v134_v15  ;;  %579 = vmatprep.mubr.msk.f32.mxu0 %vm887_vm0, %v888_v1 }
  0x9f   :  { %590 = vmatprep.mubr.msk.f32.mxu1 %vm887_vm0, %v888_v1  ;;  %613 = vmatpush3.bf16.msra.mxu1 %v612_v34 }
  0xa0   :  { %614 = vmatprep.subr.bf16.mxu1 %v886_v0  ;;  %607 = vmatpush3.bf16.msra.mxu0 %v606_v42 }
  0xa1   :  { %608 = vmatprep.subr.bf16.mxu0 %v886_v0 }
  0xa3   :  { %616 = vmatpush3.bf16.msra.mxu1 %v615_v36 }
  0xa4   :  { %610 = vmatpush3.bf16.msra.mxu0 %v609_v45 }
 0x170   :  { %v214_v16 = vpop.f32.mrb[0].mxu0 }
 0x171   :  { %v287_v17 = vpop.f32.mrb[0].mxu1  ;;  %v559_v18 = vpop.f32.mrb[1].mxu0 }
 0x172   :  { %v288_v20 = vadd.f32 %v287_v17, %v214_v16  ;;  %v570_v21 = vpop.f32.mrb[1].mxu1 }
 0x174   :  { %v298_v22 = vadd.f32 %v525_v19, %v288_v20 }
 0x176   :  { %v299_v23 = vsel %vm144_vm1, %v298_v22, -inf }
 0x177   :  { %300 = vmax.xlane.f32.xlu0 %v299_v23 }
 0x204   :  { %v301_v24 = vpop.xlane.xlu0 %300 }
 0x205   :  { %v302_v25 = vsub.f32 %v298_v22, %v301_v24 }
 0x207   :  { %v303_v26 = vmul.f32 1.442695, %v302_v25 }
 0x209   :  { %638 = vpow2.f32 %v303_v26 }
 0x213   :  { %v639_v27 = vpop.eup %638 }
 0x214   :  { %v305_v28 = vsel %vm144_vm1, %v639_v27, 0.0 }
 0x215   :  { %306 = vadd.xlane.f32.xlu0 %v305_v28 }
 0x2a2   :  { %v307_v37 = vpop.xlane.xlu0 %306 }
 0x2a3   :  { %640 = vrcp.f32 %v307_v37 }
 0x2ad   :  { %v641_v38 = vpop.eup %640 }
 0x2ae   :  { %v309_v41 = vmul.f32 %v641_v38, %v639_v27 }
 0x2b0   :  { %312 = vperm.xlu1 %635, %v309_v41  }
 0x2b4   :  { %636 = vset.pattern.permute.xlu1 %v890_v30 }
 0x2b5   :  { %317 = vperm.xlu1 %636, %v309_v41  }
 0x32f   :  { %v313_v46 = vpop.permute.xlu1 %312 }
 0x330   :  { %v315_v47 = vmul.f32 %v313_v46, %v134_v15 }
 0x332   :  { %321 = vst.msk [vmem:[#allocation17] sm:$0xff] %vm144_vm1, %v315_v47  ;;  %591 = vmatmul.mubr.msk.f32.vlgmr.msra.gmra.mrb[2].mxu1 %vm144_vm1, %v315_v47 }
 0x334   :  { %v318_v48 = vpop.permute.xlu1 %317 }
 0x335   :  { %v320_v49 = vmul.f32 %v318_v48, %v135_v14 }
 0x337   :  { %323 = vrot.lane.b32.xlu0 %v320_v49, %s891_s7  ;;  %580 = vmatmul.mubr.msk.f32.vlgmr.msra.gmra.mrb[2].mxu0 %vm144_vm1, %v320_v49 }
 0x3a9   :  { %v324_v50 = vpop.permute.xlu0 %323 }
 0x3aa   :  { %327 = vst.msk [vmem:[#allocation17] sm:$0xff] %vm326_vm2, %v324_v50 }
 0x3ab   :  { %829 = shalt.err (!%p826_p12)
}
 0x3ac   :  { %s830_s18 = scalar_lea.hbm %s1104_s9, 128 }
 0x3ad   :  { %p831_p13 = scmp.ne.s32.totalorder %s1104_s9, %s830_s18  ;;  %p834_p0 = scmp.lt.u32.totalorder %s830_s18, %s1104_s9 }
 0x3af   :  { %p836_p1 = pnand %p834_p0, %p831_p13 }
 0x3b1   :  { %839 = shalt.err (!%p836_p1)
}
 0x3b2   :  { %509 = dma.vmem_to_hbm [thread:$0]  %s507_s2, 128, %s1104_s9, [#allocation18]   ;;  %v528_v54 = vld [vmem:[#allocation14] ss:$0 sm:$0xff] }
 0x3b3   :  { %s893_s0 = smov [#allocation16]  }
 0x3b4   :  { %s496_s4 = sshll.u32 %s893_s0, 4  ;;  %s497_s4 = int_to_ptr.vmem [resolvable:$true] %s496_s4 }
 0x3b5   :  { %s840_s25 = scalar_lea.vmem %s497_s4, 128  ;;  %p845_p3 = scmp.lt.s32.totalorder %s497_s4, %s497_s4 }
 0x3b6   :  { %p841_p2 = scmp.ne.s32.totalorder %s497_s4, %s840_s25  ;;  %p846_p4 = scmp.lt.s32.totalorder %s840_s25, %s840_s25 }
 0x3b8   :  { %p847_p5 = por %p846_p4, %p845_p3 }
 0x3ba   :  { %p848_p6 = pnand %p847_p5, %p841_p2 }
 0x405   :  { %v477_v51 = vpop.f32.mrb[2].mxu1 }
 0x406   :  { %v592_v52 = vpop.f32.mrb[3].mxu1 }
 0x40a   :  { %v404_v53 = vpop.f32.mrb[2].mxu0 }
 0x40b   :  { %v478_v55 = vadd.f32 %v477_v51, %v404_v53  ;;  %v581_v56 = vpop.f32.mrb[3].mxu0 }
 0x40d   :  { %v488_v57 = vadd.f32 %v528_v54, %v478_v55 }
 0x40f   :  { %489 = vst [vmem:[#allocation16] sm:$0xff] %v488_v57 }
 0x410   :  { %851 = shalt.err (!%p848_p6)
}
 0x411   :  { %s852_s27 = scalar_lea.hbm %s1103_s8, 128 }
 0x412   :  { %p853_p7 = scmp.ne.s32.totalorder %s1103_s8, %s852_s27  ;;  %p856_p8 = scmp.lt.u32.totalorder %s852_s27, %s1103_s8 }
 0x414   :  { %p858_p9 = pnand %p856_p8, %p853_p7 }
 0x416   :  { %861 = shalt.err (!%p858_p9)
}
 0x417   :  { %499 = dma.vmem_to_hbm [thread:$0]  %s497_s4, 128, %s1103_s8, [#allocation4]  }
 0x418   :  { %872 = dma.done.wait [#allocation4], 128  }
 0x419   :  { %873 = vsyncadd [#allocation4], 4294967168 }
 0x41a   :  { %874 = dma.done.wait [#allocation18], 128  }
 0x41b   :  { %875 = vsyncadd [#allocation18], 4294967168 }
 0x41c   :  { %516 = vsyncpa [#allocation3], 1 }
 0x41d   :  { %517 = vsyncpa [#allocation6], 1 }
 0x41e   :  { %518 = vsyncpa [#allocation9], 1 }
 0x41f   :  { %519 = vsyncpa [#allocation12], 1 }
 0x420   :  { %520 = vsyncpa [#allocation15], 1 }
 0x421   :  { %521 = vsyncpa [#allocation4], 1 }
 0x422   :  { %522 = vsyncpa [#allocation18], 1 }

</bundles_post_ra>
